<compile_context>
chip_gen: v5e
topology: v5e:2x2
jax: 0.10.0
libtpu: 0.0.40
codegen_flags: <defaults>
</compile_context>

<pallas_src>
import functools

import jax
import jax.numpy as jnp
from jax.experimental import pallas as pl
from jax.experimental.pallas import tpu as pltpu


def _conv1d_bn_relu_mp_kernel(x_ref, halo_ref, w_ref, bias_ref, o_ref, xp_ref, *slab,
                              K, pad, pool, tile_L, out_tile, C_in, B_blk, fused,
                              strided_pool):
    """One (batch-block, L-tile) grid step: conv + folded-BN bias + ReLU + maxpool."""
    slab_ref = slab[0] if fused else None

    # Halo-padded bf16 window in VMEM scratch.  This single streaming copy fuses
    # the zero-pad and the bf16 cast that used to be separate wrapper HBM passes.
    # xp[:, :, j] holds zero-padded input column (tile_start - pad + j).
    xp_ref[:, :, pad:pad + tile_L] = x_ref[...].astype(jnp.bfloat16)
    if pad > 0:
        xp_ref[:, :, 0:pad] = halo_ref[:, 0, :, 0:pad].astype(jnp.bfloat16)
        xp_ref[:, :, pad + tile_L:2 * pad + tile_L] = (
            halo_ref[:, 0, :, pad:2 * pad].astype(jnp.bfloat16))

    valid = out_tile * pool  # MaxPool1d floor semantics: drop tail columns.

    for b in range(B_blk):
        if fused:
            # Small C_in: build the im2col slab with K slice-stores into VMEM
            # scratch (row k*C_in + c, col t == xp[b, c, k + t]); one fused MXU
            # dot with contraction depth K*C_in.
            for k in range(K):
                slab_ref[k * C_in:(k + 1) * C_in, :] = xp_ref[b, :, k:k + tile_L]
            acc = jnp.dot(w_ref[...], slab_ref[...],
                          preferred_element_type=jnp.float32)       # (C_out, tile_L)
        else:
            # Deep layers: K accumulating dots of depth C_in (MXU contraction is
            # already full per tap); per-tap windows slice the scratch ref.
            acc = jnp.dot(w_ref[:, pad * C_in:(pad + 1) * C_in],
                          xp_ref[b, :, pad:pad + tile_L],
                          preferred_element_type=jnp.float32)
            for k in range(K):
                if k == pad:
                    continue
                acc = acc + jnp.dot(w_ref[:, k * C_in:(k + 1) * C_in],
                                    xp_ref[b, :, k:k + tile_L],
                                    preferred_element_type=jnp.float32)

        y = jnp.maximum(acc + bias_ref[...], 0.0)    # folded BN bias + ReLU (f32)

        if strided_pool:
            # MaxPool1d(pool): strided-lane max -- a few VPU selects, no reshape
            # relayout of the (C_out, tile_L) f32 tensor.
            p = y[:, 0:valid:pool]
            for q in range(1, pool):
                p = jnp.maximum(p, y[:, q:valid:pool])
        else:
            # Conservative fallback (only used if strided slicing fails to lower).
            p = y[:, 0:valid].reshape(y.shape[0], out_tile, pool).max(axis=-1)

        o_ref[b] = p.astype(o_ref.dtype)


def _vmem_caps():
    """Generation-aware (per-step VMEM block budget, scoped vmem limit) in bytes."""
    cap = None
    try:
        cap = getattr(pltpu.get_tpu_info(), "vmem_capacity_bytes", None)
    except Exception:
        cap = None
    if not cap:
        cap = 64 * 1024 * 1024            # conservative fallback = v7x per-core VMEM
    cap = int(cap)
    budget = max((cap * 3) // 8, 8 * 1024 * 1024)    # 128MiB -> 48MiB, 64MiB -> 24MiB
    limit = max(32 * 1024 * 1024, min((cap * 7) // 8, 112 * 1024 * 1024))
    return budget, limit


def _choose_tiles(N, C_in, C_out, K, pad, L, pool, fused, x_bytes, o_bytes, budget):
    """Pick (batch block, L tile, pooled tile) under the per-step VMEM budget."""
    w_bytes = C_out * K * C_in * 2 + C_out * 4        # single-buffered constants

    def need(b, t_l, o_t):
        x_blk = 2 * b * C_in * t_l * x_bytes                  # double-buffered input
        halo = 2 * b * C_in * max(2 * pad, 1) * x_bytes
        o_blk = 2 * b * C_out * o_t * o_bytes                 # double-buffered output
        xp = b * C_in * (t_l + 2 * pad) * 2                   # bf16 padded scratch
        slb = K * C_in * t_l * 2 if fused else 0              # bf16 im2col scratch
        acc = 2 * C_out * t_l * 4                             # in-flight f32 acc/temps
        return x_blk + halo + o_blk + xp + slb + acc + w_bytes

    # L tile: multiple of 128*pool (lane-aligned input AND pooled output; a
    # multiple of 256 for pool>=2 keeps v6e/v7x's 256-wide MXU free dim fed),
    # divides L, leaves >= 2 tiles, and fits the budget at B_blk=1.
    unit = 128 * pool
    cands = [d for d in range(unit, min(L // 2, 8192) + 1, unit)
             if L % d == 0 and need(1, d, d // pool) <= budget]
    if cands:
        pref = [d for d in cands if d % 256 == 0]
        tile_L = max(pref) if pref else max(cands)
    else:
        tile_L = L
    out_tile = tile_L // pool
    G_l = L // tile_L

    # Batch block: largest divisor of N that fits, preferring >= 2 total grid
    # steps so v7x's two TensorCores (megacore) both get work.
    fitting = [d for d in range(1, N + 1)
               if N % d == 0 and need(d, tile_L, out_tile) <= budget]
    if not fitting:
        B_blk = 1
    else:
        multi = [d for d in fitting if (N // d) * G_l >= 2]
        B_blk = max(multi) if multi else max(fitting)
    return B_blk, tile_L, out_tile


def conv1d_block(x, weight, conv_bias, gamma, beta, running_mean, running_var,
                 *, pool=2, eps=1e-5, batch_block=None, tile_l=None):
    """Conv1d(K, stride=1, pad=K//2) + BatchNorm1d(eval) + ReLU + MaxPool1d(pool).

    x: (N, C_in, L) f32/bf16  ->  (N, C_out, L // pool), same dtype, NCW layout.
    """
    N, C_in, L = x.shape
    C_out, _, K = weight.shape
    pad = K // 2
    L_out = L // pool

    # --- Fold BatchNorm (eval mode) into the conv: scale -> weight, shift -> bias.
    scale = gamma / jnp.sqrt(running_var + eps)                  # (C_out,)
    bias = (conv_bias - running_mean) * scale + beta             # (C_out,)
    w_folded = weight * scale[:, None, None]                     # (C_out, C_in, K)
    # Lane-dense tap-major flat weight: w_flat[o, k*C_in + c] = w_folded[o, c, k].
    w_flat = jnp.transpose(w_folded, (0, 2, 1)).reshape(C_out, K * C_in)
    w_flat = w_flat.astype(jnp.bfloat16)
    bias2 = bias.reshape(C_out, 1).astype(jnp.float32)

    # --- Tiling under a generation-aware VMEM budget ---------------------------
    budget, vmem_limit = _vmem_caps()
    # Deep layers already fill the MXU contraction per tap -> K accumulating dots;
    # shallow layers take the fused K*C_in im2col dot (256 = v6e/v7x MXU depth).
    fused = (C_in < 256) and (K > 1)
    B_blk, tile_L, out_tile = _choose_tiles(
        N, C_in, C_out, K, pad, L, pool, fused,
        x.dtype.itemsize, x.dtype.itemsize, budget)
    if batch_block is not None:
        B_blk = int(batch_block)
    if tile_l is not None:
        tile_L = int(tile_l)
        out_tile = tile_L // pool
    assert N % B_blk == 0, "batch_block must divide N"
    assert L % tile_L == 0, "L tile must divide L"
    if tile_L != L:
        assert tile_L % pool == 0 and tile_L % 128 == 0
    G_n, G_l = N // B_blk, L // tile_L

    # --- Halo: the K//2 columns each L tile needs from its neighbours (zeros at
    # the sequence ends).  A tiny gather instead of a full jnp.pad HBM pass.
    halo_w = max(2 * pad, 1)
    if pad > 0:
        starts = jnp.arange(G_l) * tile_L
        cols = jnp.concatenate(
            [starts[:, None] - pad + jnp.arange(pad)[None, :],
             starts[:, None] + tile_L + jnp.arange(pad)[None, :]], axis=1)
        ok = (cols >= 0) & (cols < L)                             # (G_l, 2*pad)
        halo = jnp.take(x, jnp.clip(cols, 0, L - 1).reshape(-1), axis=2)
        halo = halo.reshape(N, C_in, G_l, 2 * pad)
        halo = jnp.where(ok[None, None, :, :], halo, 0)
        halo = jnp.transpose(halo, (0, 2, 1, 3))                  # (N, G_l, C_in, 2p)
    else:
        halo = jnp.zeros((N, G_l, C_in, halo_w), x.dtype)

    scratch = [pltpu.VMEM((B_blk, C_in, tile_L + 2 * pad), jnp.bfloat16)]
    if fused:
        scratch.append(pltpu.VMEM((K * C_in, tile_L), jnp.bfloat16))

    def run(const_mode, strided_pool):
        if const_mode == "single":
            const_kw = {"pipeline_mode": pl.Buffered(1)}   # invariant weight/bias
        else:
            const_kw = {}
        kernel = functools.partial(
            _conv1d_bn_relu_mp_kernel, K=K, pad=pad, pool=pool, tile_L=tile_L,
            out_tile=out_tile, C_in=C_in, B_blk=B_blk, fused=fused,
            strided_pool=strided_pool)
        in_specs = [
            pl.BlockSpec((B_blk, C_in, tile_L), lambda n, l: (n, 0, l)),
            pl.BlockSpec((B_blk, 1, C_in, halo_w), lambda n, l: (n, l, 0, 0)),
            pl.BlockSpec((C_out, K * C_in), lambda n, l: (0, 0), **const_kw),
            pl.BlockSpec((C_out, 1), lambda n, l: (0, 0), **const_kw),
        ]
        out_spec = pl.BlockSpec((B_blk, C_out, out_tile), lambda n, l: (n, 0, l))
        return pl.pallas_call(
            kernel,
            out_shape=jax.ShapeDtypeStruct((N, C_out, L_out), x.dtype),
            grid_spec=pltpu.PrefetchScalarGridSpec(
                num_scalar_prefetch=0,
                grid=(G_n, G_l),
                in_specs=in_specs,
                out_specs=out_spec,
                scratch_shapes=scratch),
            compiler_params=pltpu.CompilerParams(
                dimension_semantics=("parallel", "parallel"),
                vmem_limit_bytes=vmem_limit),
        )(x, halo, w_flat, bias2)

    # Preferred build first; fall back to progressively more conservative builds
    # if this jax build rejects Buffered(1) or strided lane slicing.
    attempts = (("single", True), (None, True), (None, False))
    last_err = None
    for const_mode, strided_pool in attempts:
        try:
            return run(const_mode, strided_pool)
        except Exception as e:  # noqa: BLE001 - retry with a safer configuration
            last_err = e
    raise last_err


def _module_reference(x, weight, conv_bias, gamma, beta, running_mean, running_var,
                      *, pool, eps, match_kernel_bf16=False):
    """Exact Conv_1d.forward math (eval-mode BN); optionally with the kernel's
    bf16 operand rounding so it can be compared at tight tolerance."""
    K = weight.shape[-1]
    if match_kernel_bf16:
        scale = gamma / jnp.sqrt(running_var + eps)
        b = (conv_bias - running_mean) * scale + beta
        w = (weight * scale[:, None, None]).astype(jnp.bfloat16).astype(jnp.float32)
        xin = x.astype(jnp.bfloat16).astype(jnp.float32)
        y = jax.lax.conv_general_dilated(
            xin, w, window_strides=(1,), padding=((K // 2, K // 2),),
            dimension_numbers=("NCH", "OIH", "NCH"))
        y = y + b[None, :, None]
    else:
        y = jax.lax.conv_general_dilated(
            x, weight, window_strides=(1,), padding=((K // 2, K // 2),),
            dimension_numbers=("NCH", "OIH", "NCH"))
        y = y + conv_bias[None, :, None]
        y = (y - running_mean[None, :, None]) / jnp.sqrt(
            running_var[None, :, None] + eps)
        y = y * gamma[None, :, None] + beta[None, :, None]
    y = jnp.maximum(y, 0.0)
    Lo = y.shape[-1] // pool
    y = y[..., :Lo * pool].reshape(y.shape[0], y.shape[1], Lo, pool)
    return y.max(axis=-1)


if __name__ == "__main__":
    def run_case(N, C_in, C_out, L, K, pool, seed):
        eps = 1e-5
        key = jax.random.PRNGKey(seed)
        kx, kw, kb, kg, kbe = jax.random.split(key, 5)
        x = jax.random.normal(kx, (N, C_in, L), dtype=jnp.float32)
        weight = jax.random.normal(kw, (C_out, C_in, K), dtype=jnp.float32) * 0.1
        conv_bias = jax.random.normal(kb, (C_out,), dtype=jnp.float32) * 0.1
        gamma = 1.0 + 0.1 * jax.random.normal(kg, (C_out,), dtype=jnp.float32)
        beta = 0.1 * jax.random.normal(kbe, (C_out,), dtype=jnp.float32)
        running_mean = 0.05 * jnp.arange(C_out, dtype=jnp.float32)
        running_var = jnp.linspace(0.5, 1.5, C_out).astype(jnp.float32)

        out = conv1d_block(x, weight, conv_bias, gamma, beta, running_mean,
                           running_var, pool=pool, eps=eps)
        out = jax.block_until_ready(out)
        assert out.shape == (N, C_out, L // pool), out.shape

        ref = _module_reference(x, weight, conv_bias, gamma, beta, running_mean,
                                running_var, pool=pool, eps=eps)
        ref_bf16 = _module_reference(x, weight, conv_bias, gamma, beta,
                                     running_mean, running_var, pool=pool, eps=eps,
                                     match_kernel_bf16=True)
        # Loose check vs exact f32 module math (kernel feeds bf16 to the MXU).
        assert jnp.allclose(out, ref, atol=1e-1, rtol=1e-1)
        # Tight check vs a reference with the same bf16 operand rounding.
        assert jnp.allclose(out, ref_bf16, atol=5e-3, rtol=5e-3)

    # Case 1 (module-consistent small shapes): fused im2col path, single L tile.
    run_case(N=2, C_in=4, C_out=8, L=16, K=3, pool=2, seed=0)
    # Case 2: deep channels + longer sequence: K accumulating dots, two L tiles
    # with halo columns, batch block of 2.
    run_case(N=2, C_in=256, C_out=16, L=1024, K=3, pool=2, seed=1)
    print("KERNEL_OK")
</pallas_src>

<mosaic_0001>
module attributes {stable_mosaic.version = 11 : i64} {
  func.func @_conv1d_bn_relu_mp_kernel(%arg0: i32, %arg1: i32, %arg2: memref<1x4x16xf32, #tpu.memory_space<vmem>>, %arg3: memref<1x1x4x2xf32, #tpu.memory_space<vmem>>, %arg4: memref<8x12xbf16, #tpu.memory_space<vmem>>, %arg5: memref<8x1xf32, #tpu.memory_space<vmem>>, %arg6: memref<1x8x8xf32, #tpu.memory_space<vmem>>, %arg7: memref<1x4x18xbf16, #tpu.memory_space<vmem>>, %arg8: memref<12x16xbf16, #tpu.memory_space<vmem>>) attributes {dimension_semantics = [#tpu.dimension_semantics<parallel>, #tpu.dimension_semantics<parallel>], iteration_bounds = array<i64: 2, 1>, scalar_prefetch = 0 : i64, scratch_operands = 2 : i64, tpu.core_type = #tpu.core_type<tc>, window_params = [{transform_indices = @transform_0, window_bounds = array<i64: 1, 4, 16>}, {transform_indices = @transform_1, window_bounds = array<i64: 1, 1, 4, 2>}, {pipeline_mode = #tpu.pipeline_mode<synchronous>, transform_indices = @transform_2, window_bounds = array<i64: 8, 12>}, {pipeline_mode = #tpu.pipeline_mode<synchronous>, transform_indices = @transform_3, window_bounds = array<i64: 8, 1>}, {transform_indices = @transform_4, window_bounds = array<i64: 1, 8, 8>}]} {
    %c0 = arith.constant 0 : index
    %c0_0 = arith.constant 0 : index
    %c0_1 = arith.constant 0 : index
    %0 = vector.load %arg2[%c0, %c0_0, %c0_1] : memref<1x4x16xf32, #tpu.memory_space<vmem>>, vector<1x4x16xf32>
    %1 = arith.truncf %0 : vector<1x4x16xf32> to vector<1x4x16xbf16>
    %c0_2 = arith.constant 0 : index
    %c0_3 = arith.constant 0 : index
    %c1 = arith.constant 1 : index
    %2 = vector.load %arg7[%c0_2, %c0_3, %c1] : memref<1x4x18xbf16, #tpu.memory_space<vmem>>, vector<1x4x16xbf16>
    tpu.vector_store %arg7[%c0_2, %c0_3, %c1], %1 {strides = array<i32>} : memref<1x4x18xbf16, #tpu.memory_space<vmem>>, vector<1x4x16xbf16>,
    %c0_4 = arith.constant 0 : index
    %c0_5 = arith.constant 0 : index
    %c0_6 = arith.constant 0 : index
    %c0_7 = arith.constant 0 : index
    %3 = vector.load %arg3[%c0_4, %c0_5, %c0_6, %c0_7] : memref<1x1x4x2xf32, #tpu.memory_space<vmem>>, vector<1x1x4x1xf32>
    %4 = vector.shape_cast %3 : vector<1x1x4x1xf32> to vector<1x4x1xf32>
    %5 = arith.truncf %4 : vector<1x4x1xf32> to vector<1x4x1xbf16>
    %c0_8 = arith.constant 0 : index
    %c0_9 = arith.constant 0 : index
    %c0_10 = arith.constant 0 : index
    %6 = vector.load %arg7[%c0_8, %c0_9, %c0_10] : memref<1x4x18xbf16, #tpu.memory_space<vmem>>, vector<1x4x1xbf16>
    tpu.vector_store %arg7[%c0_8, %c0_9, %c0_10], %5 {strides = array<i32>} : memref<1x4x18xbf16, #tpu.memory_space<vmem>>, vector<1x4x1xbf16>,
    %c0_11 = arith.constant 0 : index
    %c0_12 = arith.constant 0 : index
    %c0_13 = arith.constant 0 : index
    %c1_14 = arith.constant 1 : index
    %7 = vector.load %arg3[%c0_11, %c0_12, %c0_13, %c1_14] : memref<1x1x4x2xf32, #tpu.memory_space<vmem>>, vector<1x1x4x1xf32>
    %8 = vector.shape_cast %7 : vector<1x1x4x1xf32> to vector<1x4x1xf32>
    %9 = arith.truncf %8 : vector<1x4x1xf32> to vector<1x4x1xbf16>
    %c0_15 = arith.constant 0 : index
    %c0_16 = arith.constant 0 : index
    %c17 = arith.constant 17 : index
    %10 = vector.load %arg7[%c0_15, %c0_16, %c17] : memref<1x4x18xbf16, #tpu.memory_space<vmem>>, vector<1x4x1xbf16>
    tpu.vector_store %arg7[%c0_15, %c0_16, %c17], %9 {strides = array<i32>} : memref<1x4x18xbf16, #tpu.memory_space<vmem>>, vector<1x4x1xbf16>,
    %c0_17 = arith.constant 0 : index
    %c0_18 = arith.constant 0 : index
    %c0_19 = arith.constant 0 : index
    %11 = vector.load %arg7[%c0_17, %c0_18, %c0_19] : memref<1x4x18xbf16, #tpu.memory_space<vmem>>, vector<1x4x16xbf16>
    %12 = vector.shape_cast %11 : vector<1x4x16xbf16> to vector<4x16xbf16>
    %c0_20 = arith.constant 0 : index
    %c0_21 = arith.constant 0 : index
    %13 = vector.load %arg8[%c0_20, %c0_21] : memref<12x16xbf16, #tpu.memory_space<vmem>>, vector<4x16xbf16>
    tpu.vector_store %arg8[%c0_20, %c0_21], %12 {strides = array<i32>} : memref<12x16xbf16, #tpu.memory_space<vmem>>, vector<4x16xbf16>,
    %c0_22 = arith.constant 0 : index
    %c0_23 = arith.constant 0 : index
    %c1_24 = arith.constant 1 : index
    %14 = vector.load %arg7[%c0_22, %c0_23, %c1_24] : memref<1x4x18xbf16, #tpu.memory_space<vmem>>, vector<1x4x16xbf16>
    %15 = vector.shape_cast %14 : vector<1x4x16xbf16> to vector<4x16xbf16>
    %c4 = arith.constant 4 : index
    %c0_25 = arith.constant 0 : index
    %16 = vector.load %arg8[%c4, %c0_25] : memref<12x16xbf16, #tpu.memory_space<vmem>>, vector<4x16xbf16>
    tpu.vector_store %arg8[%c4, %c0_25], %15 {strides = array<i32>} : memref<12x16xbf16, #tpu.memory_space<vmem>>, vector<4x16xbf16>,
    %c0_26 = arith.constant 0 : index
    %c0_27 = arith.constant 0 : index
    %c2 = arith.constant 2 : index
    %17 = vector.load %arg7[%c0_26, %c0_27, %c2] : memref<1x4x18xbf16, #tpu.memory_space<vmem>>, vector<1x4x16xbf16>
    %18 = vector.shape_cast %17 : vector<1x4x16xbf16> to vector<4x16xbf16>
    %c8 = arith.constant 8 : index
    %c0_28 = arith.constant 0 : index
    %19 = vector.load %arg8[%c8, %c0_28] : memref<12x16xbf16, #tpu.memory_space<vmem>>, vector<4x16xbf16>
    tpu.vector_store %arg8[%c8, %c0_28], %18 {strides = array<i32>} : memref<12x16xbf16, #tpu.memory_space<vmem>>, vector<4x16xbf16>,
    %c0_29 = arith.constant 0 : index
    %c0_30 = arith.constant 0 : index
    %20 = vector.load %arg4[%c0_29, %c0_30] : memref<8x12xbf16, #tpu.memory_space<vmem>>, vector<8x12xbf16>
    %c0_31 = arith.constant 0 : index
    %c0_32 = arith.constant 0 : index
    %21 = vector.load %arg8[%c0_31, %c0_32] : memref<12x16xbf16, #tpu.memory_space<vmem>>, vector<12x16xbf16>
    %cst = arith.constant dense<0.000000e+00> : vector<8x16xf32>
    %22 = tpu.matmul %20, %21, %cst {dimension_numbers = #tpu.dot_dimension_numbers<[1], [0], [0], [1], [0, 0, 1, 1], [], []>} : vector<8x12xbf16>, vector<12x16xbf16>, vector<8x16xf32> -> vector<8x16xf32>
    %c0_33 = arith.constant 0 : index
    %c0_34 = arith.constant 0 : index
    %23 = vector.load %arg5[%c0_33, %c0_34] : memref<8x1xf32, #tpu.memory_space<vmem>>, vector<8x1xf32>
    %24 = vector.broadcast %23 : vector<8x1xf32> to vector<8x16xf32>
    %25 = arith.addf %22, %24 : vector<8x16xf32>
    %cst_35 = arith.constant 0.000000e+00 : f32
    %26 = vector.broadcast %cst_35 : f32 to vector<8x16xf32>
    %27 = arith.maximumf %25, %26 : vector<8x16xf32>
    %28 = vector.shape_cast %27 : vector<8x16xf32> to vector<8x8x2xf32>
    %cst_36 = arith.constant dense<0xFF800000> : vector<8x8xf32>
    %29 = vector.multi_reduction <maximumf>, %28, %cst_36 [2] : vector<8x8x2xf32> to vector<8x8xf32>
    %c0_37 = arith.constant 0 : index
    %c0_38 = arith.constant 0 : index
    %c0_39 = arith.constant 0 : index
    %30 = vector.load %arg6[%c0_37, %c0_38, %c0_39] : memref<1x8x8xf32, #tpu.memory_space<vmem>>, vector<1x8x8xf32>
    %31 = vector.shape_cast %30 : vector<1x8x8xf32> to vector<8x8xf32>
    %32 = vector.shape_cast %29 : vector<8x8xf32> to vector<1x8x8xf32>
    tpu.vector_store %arg6[%c0_37, %c0_38, %c0_39], %32 {strides = array<i32>} : memref<1x8x8xf32, #tpu.memory_space<vmem>>, vector<1x8x8xf32>,
    return
  }
  func.func @transform_0(%arg0: i32, %arg1: i32) -> (i32, i32, i32) {
    %c0_i32 = arith.constant 0 : i32
    %c0_i32_0 = arith.constant 0 : i32
    return %arg0, %c0_i32, %arg1 : i32, i32, i32
  }
  func.func @transform_1(%arg0: i32, %arg1: i32) -> (i32, i32, i32, i32) {
    %c0_i32 = arith.constant 0 : i32
    %c0_i32_0 = arith.constant 0 : i32
    %c0_i32_1 = arith.constant 0 : i32
    return %arg0, %arg1, %c0_i32, %c0_i32_0 : i32, i32, i32, i32
  }
  func.func @transform_2(%arg0: i32, %arg1: i32) -> (i32, i32) {
    %c0_i32 = arith.constant 0 : i32
    %c0_i32_0 = arith.constant 0 : i32
    %c0_i32_1 = arith.constant 0 : i32
    return %c0_i32, %c0_i32_0 : i32, i32
  }
  func.func @transform_3(%arg0: i32, %arg1: i32) -> (i32, i32) {
    %c0_i32 = arith.constant 0 : i32
    %c0_i32_0 = arith.constant 0 : i32
    %c0_i32_1 = arith.constant 0 : i32
    return %c0_i32, %c0_i32_0 : i32, i32
  }
  func.func @transform_4(%arg0: i32, %arg1: i32) -> (i32, i32, i32) {
    %c0_i32 = arith.constant 0 : i32
    %c0_i32_0 = arith.constant 0 : i32
    return %arg0, %c0_i32, %arg1 : i32, i32, i32
  }
}

</mosaic_0001>

<bundles_post_ra>
// kernel: tpu_custom_call.1
= control target key start
LH: loop header
LB: loop body
LE: loop exit
PB: predicated region body
PF: predicated region fallthrough
CT: control target
= control target key end

     0   :  { %9 = vsyncpa [#allocation5], 0  ;;  %s987_s0 = inlined_call_operand.vmem [shape: f32[2,4,16], index: 0, kind: input, shape index: {}]   ;;  %s988_s1 = inlined_call_operand.vmem [shape: f32[2,1,4,2], index: 1, kind: input, shape index: {}]   ;;  %s989_s2 = inlined_call_operand.vmem [shape: bf16[8,12], index: 2, kind: input, shape index: {}]   ;;  %s990_s3 = inlined_call_operand.vmem [shape: f32[8,1], index: 3, kind: input, shape index: {}]   ;;  %s991_s4 = inlined_call_operand.hbm [shape: f32[2,8,8], index: 4, kind: output, shape index: {}]  }
   0x1   :  { %11 = vsyncpa [#allocation5 + $0x1], 0  ;;  %s841_s15 = smov 0   ;;  %s843_s16 = smov 0  }
   0x2   :  { %s845_s17 = smov 0   ;;  %s847_s18 = smov 0  }
   0x3   :  { %s849_s19 = smov 0   ;;  %s851_s20 = smov 0  }
   0x4 LB: > { %s635_s21 = sadd.s32 4294967295, %s801_s20   ;;  %s636_s22 = sadd.s32 4294967294, %s801_s20   ;;  %s801_s20 = sphi %s851_s20, %s17_s20   ;;  %s797_s19 = sphi %s849_s19, %s998_s19   ;;  %s793_s18 = sphi %s847_s18, %s997_s18   ;;  %s789_s17 = sphi %s845_s17, %s996_s17   ;;  %s785_s16 = sphi %s843_s16, %s995_s16   ;;  %s781_s15 = sphi %s841_s15, %s994_s15  }
   0x5   : > { %s29_s23 = sadd.s32 1, %s797_s19  ;;  %s136_s24 = sadd.s32 1, %s789_s17 }
   0x6   : > { %p31_p0 = scmp.ge.s32.totalorder %s29_s23, 2  ;;  %p146_p1 = scmp.ne.s32.totalorder %s789_s17, %s785_s16 }
   0x7   : > { %p147_p2 = scmp.eq.s32.totalorder %s635_s21, 1  ;;  %p152_p3 = scmp.ne.s32.totalorder %s785_s16, %s781_s15 }
   0x8   : > { %s1000_s23 = smov (%p31_p0, %s29_s23), 0  ;;  %p153_p5 = scmp.eq.s32.totalorder %s636_s22, 1 }
   0x9   : > { %p881_p4 = por %p147_p2, %p146_p1  ;;  %s131_s26 = ssub.s32 %s797_s19, %s1000_s23 }
   0xa   : > { %p639_p6 = scmp.ge.s32.totalorder %s801_s20, 1  ;;  %p134_p7 = scmp.eq.s32.totalorder %s131_s26, 0 }
   0xb   : > { %p888_p8 = por %p153_p5, %p152_p3  ;;  %p197_p9 = scmp.lt.s32.totalorder %s801_s20, 3 }
   0xc   : > { %s894_s28 = scalar_select %p134_p7, %s789_s17, %s136_s24  }
   0xd   : > { %p198_p10 = pnand %p639_p6, %p197_p9 }
   0xe   : > { %p232_p11 = scmp.lt.s32.totalorder (!%p198_p10), %s793_s18, 1  ;;  %s803_s11 = smov (!%p198_p10), 1  }
   0xf   : > { %201 = sbr.rel (%p198_p10) target bundleno = 710 (0x2c6), region = 36  ;;  %s804_s12 = smov (!%p198_p10), 16  }
  0x10   : > { %s805_s13 = smov (!%p198_p10), 127   ;;  %s806_s14 = smov (!%p198_p10), 126  }
  0x11   : > { %s810_s5 = smov (!%p198_p10), 122   ;;  %s811_s6 = smov (!%p198_p10), 118  }
  0x12   : > { %s813_s8 = smov (!%p198_p10), 120   ;;  %s229_s9 = sand.u32 (!%p198_p10), 1, %s785_s16  }
  0x14   : > { %s233_s29 = scalar_select %p232_p11, %s793_s18, 1  ;;  %vm251_vm0 = vcmask 1041408   ;;  %vm259_vm1 = vcmask 132104   ;;  %vm263_vm2 = vcmask 1024   ;;  %vm276_vm3 = vcmask 140424   ;;  %v304_v17 = vld [vmem:[%s990_s3] sm:$0xff] }
  0x15   : > { %vm279_vm4 = vcmask 123904   ;;  %v807_v18 = vmov 0   ;;  %vm290_vm5 = vcmask 125954   ;;  %vm319_vm6 = vcmask 1045504   ;;  %v301_v25 = vld [vmem:[%s989_s2] sm:$0xf] }
  0x16   : > { %s641_s30 = sshll.u32 %s233_s29, 2  ;;  %721 = vset.pattern.permute.xlu2 %v807_v18  ;;  %722 = vset.pattern.permute.xlu0 %v807_v18  ;;  %vm315_vm7 = vcmask 97280   ;;  %s808_s29 = smov 116   ;;  %v814_v33 = vmov 1983009808   ;;  %vm360_vm8 = vcmask 1047556  }
  0x17   : > { %s238_s7 = scalar_lea.vmem %s987_s0, %s641_s30  ;;  %s245_s10 = scalar_lea.vmem %s988_s1, %s641_s30  ;;  %307 = vperm.xlu2 %721, %v304_v17   ;;  %v365_v34 = vunpack.c.l.s4 %v814_v33  ;;  %v815_v44 = vmov 1934713408   ;;  %vm472_vm9 = vcmask 15360   ;;  %vm515_vm10 = vcmask 1041409  }
  0x18   : > { %v247_v0 = vld [vmem:[%s238_s7] sm:$0xf]  ;;  %s809_s30 = smov 114   ;;  %s812_s7 = smov 124   ;;  %v413_v45 = vunpack.c.l.s4 %v815_v44  ;;  %vm517_vm11 = vcmask 1042434   ;;  %vm519_vm12 = vcmask 1043459  }
  0x19   : > { %v265_v1 = vld [vmem:[%s245_s10] sm:$0xf]  ;;  %v248_v2 = vpack.c.bf16 %v247_v0, %v247_v0  ;;  %v366_v41 = vunpack.c.0.s8 %v365_v34  ;;  %vm521_vm13 = vcmask 1044484   ;;  %vm523_vm14 = vcmask 1045509  }
  0x1a   : > { %v266_v4 = vpack.c.bf16 %v265_v1, %v265_v1  ;;  %v261_v8 = vld [vmem:[%s245_s10] sm:$0xf]  ;;  %v414_v55 = vunpack.c.0.s8 %v413_v45  ;;  %s640_s10 = sshll.u32 %s229_s9, 3  ;;  %vm525_vm15 = vcmask 1046534  }
  0x1b   : > { %v250_v3 = vrot.slane %v248_v2, 2  ;;  %v262_v9 = vpack.c.bf16 %v261_v8, %v261_v8  ;;  %s231_s21 = scalar_lea.vmem [#allocation4], %s640_s10 }
  0x1c   : > { %v268_v6 = vrot.slane %v266_v4, 2  ;;  %s546_s22 = sshll.u32 %s231_s21, 4  ;;  %s547_s22 = int_to_ptr.vmem [resolvable:$true] %s546_s22 }
  0x1d   : > { %v254_v5 = vsel %vm251_vm0, %v248_v2, %v250_v3 }
  0x1e   : > { %256 = vrot.lane.b32.xlu0 %v254_v5, %s803_s11  ;;  %v271_v7 = vsel %vm251_vm0, %v266_v4, %v268_v6  ;;  %s649_s11 = sshll.u32 %s793_s18, 3  ;;  %vm527_vm0 = vcmask 1047559   ;;  %s533_s18 = scalar_lea.sflag [#allocation5], %s229_s9 }
  0x26   : > { %273 = vrot.lane.b32.xlu0 %v271_v7, %s804_s12 }
  0x71   : > { %v308_v26 = vpop.permute.xlu2 %307 }
  0x90   : > { %v257_v10 = vpop.permute.xlu0 %256 }
  0x91   : > { %260 = vst.msk [vmem:[#allocation2] sm:$0x3] %vm259_vm1, %v257_v10  ;;  %vm530_vm1 = vcmask 64512  }
  0x92   : > { %264 = vst.msk [vmem:[#allocation2] sm:$0x3] %vm263_vm2, %v262_v9 }
  0x98   : > { %v274_v11 = vpop.permute.xlu0 %273 }
  0x99   : > { %277 = vst.msk [vmem:[#allocation2] sm:$0x3] %vm276_vm3, %v274_v11 }
  0xa0   : > { %v281_v12 = vld [vmem:[#allocation2] sm:$0x3] }
  0xa1   : > { %v278_v13 = vld [vmem:[#allocation2] sm:$0x3]  ;;  %284 = vst [vmem:[#allocation1 + $0x1] ss:$2 sm:$0xff] %v281_v12 }
  0xa2   : > { %280 = vst.msk [vmem:[#allocation3] sm:$0x3] %vm279_vm4, %v278_v13  ;;  %v292_v15 = vld [vmem:[#allocation2] sm:$0x3] }
  0xa8   : > { %v285_v14 = vld.sshfl [vmem:[#allocation1] sm:$0xff pattern:$0x75643120] }
  0xa9   : > { %287 = vrot.lane.b32.xlu1 %v285_v14, %s805_s13  ;;  %294 = vst [vmem:[#allocation1] ss:$2 sm:$0xff] %v292_v15 }
  0xb0   : > { %v295_v16 = vld.sshfl [vmem:[#allocation1] sm:$0xff pattern:$0x75643120] }
  0xb1   : > { %297 = vrot.lane.b32.xlu1 %v295_v16, %s806_s14 }
 0x11b   : > { %v288_v19 = vpop.permute.xlu1 %287 }
 0x11c   : > { %291 = vst.msk [vmem:[#allocation3] sm:$0xc] %vm290_vm5, %v288_v19 }
 0x123   : > { %v298_v20 = vpop.permute.xlu1 %297  ;;  %v645_v21 = vld [vmem:[#allocation3] sm:$0xf] }
 0x124   : > { %300 = vst.msk [vmem:[#allocation3 + $0x4] sm:$0x3] %vm279_vm4, %v298_v20 }
 0x12b   : > { %v652_v22 = vld [vmem:[#allocation3] sm:$0x30] }
 0x12c   : > { %v646_v23 = vor.u32 %v652_v22, %v645_v21 }
 0x12e   : > { %v321_v24 = vsel %vm319_vm6, %v646_v23, 0 }
 0x12f   : > { %330 = vmatpush.bf16.msra.mxu0 %v321_v24 }
 0x132   : > { %647 = vmatmul.msk.bf16.vlgmr.msra.gmra.mxu0 %vm315_vm7, %v301_v25 }
 0x1af   : > { %v332_v27 = vpop.f32.mrf.mxu0 }
 0x1b0   : > { %v333_v28 = vadd.f32 %v332_v27, %v308_v26 }
 0x1b2   : > { %v336_v29 = vmax.f32 %v333_v28, 0.0 }
 0x1b4   : > { %353 = vrot.lane.b32.xlu1 %v336_v29, %s808_s29  ;;  %356 = vrot.lane.b32.xlu0 %v336_v29, %s809_s30  ;;  %v362_v50 = vrot.slane %v336_v29, 4 }
 0x1b5   : > { %344 = vrot.lane.b32.xlu2 %v336_v29, %s810_s5 }
 0x1b7   : > { %v334_v30 = vpop.f32.mrf.mxu0 }
 0x1bc   : > { %350 = vrot.lane.b32.xlu1 %v336_v29, %s811_s6  ;;  %341 = vrot.lane.b32.xlu0 %v336_v29, %s812_s7  ;;  %s743_s6 = scalar_lea.hbm %s991_s4, 16 }
 0x1bd   : > { %338 = vrot.lane.b32.xlu2 %v336_v29, %s806_s14  ;;  %s544_s14 = scalar_lea.hbm %s991_s4, %s649_s11 }
 0x1be   : > { %s548_s24 = sshll.u32 %s544_s14, 4  ;;  %s549_s24 = int_to_ptr.hbm [resolvable:$true] %s548_s24 }
 0x1bf   : > { %s737_s26 = sshra.s32 %s549_s24, 4  ;;  %s738_s26 = int_to_ptr.hbm [resolvable:$true] %s737_s26 }
 0x1c0   : > { %s739_s29 = scalar_lea.hbm %s738_s26, 8  ;;  %p744_p1 = scmp.lt.s32.totalorder %s738_s26, %s991_s4 }
 0x1c1   : > { %p740_p12 = scmp.ne.s32.totalorder %s738_s26, %s739_s29  ;;  %p745_p2 = scmp.lt.s32.totalorder %s743_s6, %s739_s29 }
 0x1c3   : > { %p741_p13 = pnand %p740_p12, %p881_p4  ;;  %p746_p3 = por %p745_p2, %p744_p1 }
 0x1c5   : > { %347 = vrot.lane.b32.xlu2 %v336_v29, %s813_s8  ;;  %p742_p0 = pneg %p741_p13 }
 0x1c7   : > { %p747_p5 = pnand %p746_p3, %p742_p0 }
 0x20f   : > { %v345_v31 = vpop.permute.xlu2 %344 }
 0x210   : > { %v372_v39 = vrot.slane %v345_v31, 4 }
 0x217   : > { %v339_v32 = vpop.permute.xlu2 %338 }
 0x218   : > { %v374_v37 = vrot.slane %v339_v32, 4  ;;  %v373_v43 = vsel %vm360_vm8, %v372_v39, %v339_v32 }
 0x219   : > { %v379_v48 = vperm.slane %v373_v43, %v366_v41 }
 0x21a   : > { %v375_v46 = vsel %vm360_vm8, %v345_v31, %v374_v37 }
 0x21b   : > { %v383_v51 = vperm.slane %v375_v46, %v366_v41  ;;  %v408_v63 = vrot.slane %v379_v48, 4 }
 0x21d   : > { %v420_v7 = vrot.slane %v383_v51, 4 }
 0x21f   : > { %v348_v40 = vpop.permute.xlu2 %347 }
 0x220   : > { %v386_v52 = vrot.slane %v348_v40, 4 }
 0x226   : > { %v354_v35 = vpop.permute.xlu1 %353  ;;  %v357_v36 = vpop.permute.xlu0 %356 }
 0x227   : > { %v384_v38 = vrot.slane %v354_v35, 4  ;;  %v396_v49 = vrot.slane %v357_v36, 4  ;;  %v387_v60 = vsel %vm360_vm8, %v354_v35, %v386_v52  ;;  %v505_v52 = vlaneseq }
 0x228   : > { %v395_v8 = vperm.slane %v387_v60, %v366_v41 }
 0x229   : > { %v385_v42 = vsel %vm360_vm8, %v384_v38, %v348_v40 }
 0x22a   : > { %v391_v47 = vperm.slane %v385_v42, %v366_v41 }
 0x22c   : > { %v434_v61 = vrot.slane %v391_v47, 4 }
 0x22e   : > { %v351_v53 = vpop.permute.xlu1 %350  ;;  %v342_v54 = vpop.permute.xlu0 %341 }
 0x22f   : > { %v397_v56 = vsel %vm360_vm8, %v396_v49, %v351_v53  ;;  %v398_v57 = vrot.slane %v351_v53, 4  ;;  %v359_v58 = vrot.slane %v342_v54, 4  ;;  %v363_v59 = vsel %vm360_vm8, %v342_v54, %v362_v50 }
 0x230   : > { %v403_v62 = vperm.slane %v397_v56, %v366_v41  ;;  %v371_v2 = vperm.slane %v363_v59, %v366_v41  ;;  %v506_v53 = vand.u32 127, %v505_v52 }
 0x231   : > { %v399_v0 = vsel %vm360_vm8, %v357_v36, %v398_v57  ;;  %v361_v1 = vsel %vm360_vm8, %v359_v58, %v336_v29  ;;  %v446_v29 = vrot.slane %v395_v8, 4 }
 0x232   : > { %v407_v3 = vperm.slane %v399_v0, %v366_v41  ;;  %v432_v4 = vrot.slane %v403_v62, 4  ;;  %v435_v5 = vsel %vm360_vm8, %v403_v62, %v434_v61  ;;  %v367_v6 = vperm.slane %v361_v1, %v366_v41 }
 0x233   : > { %v443_v9 = vperm.slane %v435_v5, %v414_v55  ;;  %v421_v16 = vsel %vm360_vm8, %v420_v7, %v371_v2  ;;  %v422_v23 = vrot.slane %v371_v2, 4 }
 0x234   : > { %v444_v10 = vrot.slane %v407_v3, 4  ;;  %v410_v11 = vrot.slane %v367_v6, 4  ;;  %v409_v12 = vsel %vm360_vm8, %v408_v63, %v367_v6  ;;  %v433_v13 = vsel %vm360_vm8, %v432_v4, %v391_v47 }
 0x235   : > { %v415_v14 = vperm.slane %v409_v12, %v414_v55  ;;  %v439_v15 = vperm.slane %v433_v13, %v414_v55  ;;  %v460_v20 = vrot.slane %v443_v9, 4  ;;  %v427_v28 = vperm.slane %v421_v16, %v414_v55 }
 0x236   : > { %v411_v17 = vsel %vm360_vm8, %v379_v48, %v410_v11  ;;  %v445_v18 = vsel %vm360_vm8, %v444_v10, %v395_v8  ;;  %v447_v35 = vsel %vm360_vm8, %v407_v3, %v446_v29  ;;  %v423_v37 = vsel %vm360_vm8, %v383_v51, %v422_v23 }
 0x237   : > { %v419_v19 = vperm.slane %v411_v17, %v414_v55  ;;  %v458_v21 = vrot.slane %v415_v14, 4  ;;  %v456_v22 = vrot.slane %v439_v15, 4  ;;  %v451_v24 = vperm.slane %v445_v18, %v414_v55 }
 0x238   : > { %v466_v36 = vrot.slane %v427_v28, 4  ;;  %v455_v40 = vperm.slane %v447_v35, %v414_v55  ;;  %v431_v42 = vperm.slane %v423_v37, %v414_v55 }
 0x239   : > { %v461_v25 = vsel %vm360_vm8, %v460_v20, %v419_v19  ;;  %v459_v26 = vsel %vm360_vm8, %v439_v15, %v458_v21  ;;  %v457_v27 = vsel %vm360_vm8, %v456_v22, %v415_v14  ;;  %v462_v33 = vrot.slane %v419_v19, 4 }
 0x23a   : > { %v479_v30 = vsel %vm472_vm9, %v461_v25, -inf  ;;  %v476_v31 = vsel %vm472_vm9, %v459_v26, -inf  ;;  %v473_v32 = vsel %vm472_vm9, %v457_v27, -inf  ;;  %v464_v34 = vrot.slane %v451_v24, 4 }
 0x23b   : > { %480 = vmax.xlane.f32.xlu2 %v479_v30  ;;  %477 = vmax.xlane.f32.xlu1 %v476_v31  ;;  %v463_v38 = vsel %vm360_vm8, %v443_v9, %v462_v33  ;;  %v467_v39 = vsel %vm360_vm8, %v451_v24, %v466_v36  ;;  %v468_v46 = vrot.slane %v455_v40, 4  ;;  %v470_v47 = vrot.slane %v431_v42, 4 }
 0x23c   : > { %474 = vmax.xlane.f32.xlu0 %v473_v32  ;;  %v465_v41 = vsel %vm360_vm8, %v464_v34, %v427_v28  ;;  %v482_v43 = vsel %vm472_vm9, %v463_v38, -inf  ;;  %v488_v44 = vsel %vm472_vm9, %v467_v39, -inf }
 0x23d   : > { %v485_v45 = vsel %vm472_vm9, %v465_v41, -inf  ;;  %v469_v48 = vsel %vm360_vm8, %v468_v46, %v431_v42  ;;  %v471_v49 = vsel %vm360_vm8, %v455_v40, %v470_v47 }
 0x23e   : > { %v491_v50 = vsel %vm472_vm9, %v469_v48, -inf  ;;  %v494_v51 = vsel %vm472_vm9, %v471_v49, -inf }
 0x243   : > { %483 = vmax.xlane.f32.xlu2 %v482_v43  ;;  %489 = vmax.xlane.f32.xlu1 %v488_v44 }
 0x244   : > { %486 = vmax.xlane.f32.xlu0 %v485_v45 }
 0x24b   : > { %492 = vmax.xlane.f32.xlu2 %v491_v50 }
 0x24c   : > { %495 = vmax.xlane.f32.xlu0 %v494_v51 }
 0x2ae   : > { %v481_v54 = vpop.xlane.xlu2 %480  ;;  %v478_v55 = vpop.xlane.xlu1 %477 }
 0x2af   : > { %v475_v56 = vpop.xlane.xlu0 %474  ;;  %v508_v57 = vperm.slane %v478_v55, %v506_v53  ;;  %v509_v59 = vperm.slane %v481_v54, %v506_v53 }
 0x2b0   : > { %v507_v58 = vperm.slane %v475_v56, %v506_v53 }
 0x2b2   : > { %v516_v60 = vsel %vm515_vm10, %v508_v57, %v507_v58 }
 0x2b3   : > { %v518_v0 = vsel %vm517_vm11, %v509_v59, %v516_v60 }
 0x2b6   : > { %v484_v61 = vpop.xlane.xlu2 %483  ;;  %v490_v3 = vpop.xlane.xlu1 %489 }
 0x2b7   : > { %v510_v62 = vperm.slane %v484_v61, %v506_v53  ;;  %v487_v63 = vpop.xlane.xlu0 %486  ;;  %v512_v5 = vperm.slane %v490_v3, %v506_v53 }
 0x2b8   : > { %v511_v1 = vperm.slane %v487_v63, %v506_v53 }
 0x2b9   : > { %v520_v2 = vsel %vm519_vm12, %v510_v62, %v518_v0 }
 0x2ba   : > { %v522_v4 = vsel %vm521_vm13, %v511_v1, %v520_v2 }
 0x2bb   : > { %v524_v9 = vsel %vm523_vm14, %v512_v5, %v522_v4 }
 0x2be   : > { %v493_v6 = vpop.xlane.xlu2 %492 }
 0x2bf   : > { %v513_v7 = vperm.slane %v493_v6, %v506_v53  ;;  %v496_v8 = vpop.xlane.xlu0 %495 }
 0x2c0   : > { %v514_v10 = vperm.slane %v496_v8, %v506_v53 }
 0x2c1   : > { %v526_v11 = vsel %vm525_vm15, %v513_v7, %v524_v9 }
 0x2c2   : > { %v528_v12 = vsel %vm527_vm0, %v514_v10, %v526_v11 }
 0x2c3   : > { %531 = vst.msk [vmem:[%s231_s21] sm:$0xff] %vm530_vm1, %v528_v12 }
 0x2c4   : > { %750 = shalt.err (!%p747_p5)
}
 0x2c5   : > { %653 = dma.vmem_to_hbm [thread:$0]  (%p881_p4), %s547_s22, 128, %s549_s24, %s533_s18  }
 0x2c6 PF: > { %p659_p6 = scmp.ge.s32.totalorder %s801_s20, 2  ;;  %s560_s9 = sand.u32 1, %s781_s15  }
 0x2c7   : > { %s561_s10 = scalar_lea.sflag [#allocation5], %s560_s9 }
 0x2c8   : > { %p656_p7 = pnand %p659_p6, %p888_p8 }
 0x2ca   : > { %p657_p9 = pneg %p656_p7 }
 0x2cc   : > { %776 = dma.done.wait (%p657_p9), %s561_s10, 128  }
 0x2cd   : > { %778 = vsyncadd (%p657_p9), %s561_s10, 4294967168  ;;  %s17_s20 = sadd.s32 1, %s801_s20   ;;  %s994_s15 = smov %s785_s16 }
 0x2ce   : > { %p14_p10 = scmp.ge.s32.totalorder %s17_s20, 4   ;;  %s995_s16 = smov %s789_s17 }
 0x2cf   : > { %s996_s17 = smov %s894_s28  ;;  %s997_s18 = smov %s797_s19 }
 0x2d0   : > { %s998_s19 = smov %s1000_s23  ;;  %16 = sbr.rel (!%p14_p10) target bundleno = 4 (0x4), region = 75 }
 0x2d5   :  { %567 = vsyncpa [#allocation5], 1 }
 0x2d6   :  { %569 = vsyncpa [#allocation5 + $0x1], 1 }

</bundles_post_ra>
